<compile_context>
chip_gen: v7x
topology: tpu7x:2x2x1
jax: 0.10.0
libtpu: 0.0.40
codegen_flags: <defaults>
</compile_context>

<pallas_src>
import functools
import math

import jax
import jax.numpy as jnp
from jax import lax
from jax.experimental import pallas as pl
from jax.experimental.pallas import tpu as pltpu


def _round_up(x, m):
    return (x + m - 1) // m * m


def _dot_nt(x, w, compute_dtype):
    """x:(tm,tk) . w:(tn,tk) contracted on K (flash-attn Q.K^T pattern)."""
    if compute_dtype is not None:
        x = x.astype(compute_dtype)
        w = w.astype(compute_dtype)
    return lax.dot_general(
        x, w,
        dimension_numbers=(((1,), (1,)), ((), ())),
        preferred_element_type=jnp.float32)


def _linear_kernel_single_k(x_ref, w_ref, b_ref, o_ref, *, compute_dtype):
    """Whole reduction in one block: no scratch, no predicates."""
    acc = _dot_nt(x_ref[...], w_ref[...], compute_dtype)
    o_ref[...] = (acc + b_ref[...].astype(jnp.float32)).astype(o_ref.dtype)


def _linear_kernel_multi_k(x_ref, w_ref, b_ref, o_ref, acc_ref, *, compute_dtype):
    """K is split across grid axis 2 (innermost); f32 accumulator scratch."""
    k = pl.program_id(2)

    @pl.when(k == 0)
    def _init():
        acc_ref[...] = jnp.zeros_like(acc_ref)

    acc_ref[...] += _dot_nt(x_ref[...], w_ref[...], compute_dtype)

    @pl.when(k == pl.num_programs(2) - 1)
    def _epilogue():
        # Bias add + cast once per output tile (not per K step).
        o_ref[...] = (acc_ref[...] + b_ref[...].astype(jnp.float32)
                      ).astype(o_ref.dtype)


def img_linear(x, weight, bias, *, tm=512, tn=512, tk=2048,
               compute_dtype=jnp.bfloat16):
    """Pallas equivalent of nn.Linear(input_dim, output_dim)(x).

    Args:
      x:      (..., input_dim)
      weight: (output_dim, input_dim)   -- PyTorch convention, used as-is
      bias:   (output_dim,)
      compute_dtype: dtype fed to the MXU when both operands are stored f32
        (accumulation stays f32).  Pass None (or jnp.float32) for exact f32.
    Returns:
      (..., output_dim), same dtype as x.
    """
    *lead, K = x.shape
    N, k_w = weight.shape
    assert K == k_w, f"input_dim mismatch: {K} vs {k_w}"

    m = math.prod(lead) if lead else 1
    x2d = x.reshape(m, K)
    out_dtype = x.dtype

    # Only down-cast when both operands are stored f32; otherwise use as-is.
    cd = compute_dtype
    if cd is not None:
        same = (jnp.dtype(x.dtype) == jnp.dtype(jnp.float32)
                and jnp.dtype(weight.dtype) == jnp.dtype(jnp.float32))
        if not same or jnp.dtype(cd) == jnp.dtype(jnp.float32):
            cd = None

    # ---- M tiling: never pad.  Ragged edge rows read stale VMEM that only
    # feeds output rows discarded by the clipped store.
    if m <= tm:
        tm = m                       # full-extent block: any size allowed
    else:
        tm = _round_up(tm, 32)       # native sublane tile for f32/bf16/int8
    grid_m = pl.cdiv(m, tm)

    # ---- N tiling: never pad.  Prefer a lane-dense divisor of N; otherwise
    # fall back to a multiple-of-128 tile with a ragged (clipped) edge block.
    if N <= tn:
        tn = N
    else:
        t = (tn // 128) * 128
        chosen = None
        while t >= 128:
            if N % t == 0:
                chosen = t
                break
            t -= 128
        tn = chosen if chosen is not None else (tn // 128) * 128
    # v7x: if there is only one (M, N) output tile, split N so the second
    # TensorCore gets a "parallel" tile (harmless on v5e/v6e).
    if grid_m == 1 and tn >= N and N >= 256:
        tn = _round_up(pl.cdiv(N, 2), 128)
    grid_n = pl.cdiv(N, tn)

    # ---- K tiling: pad only when strictly required for reduction correctness.
    kp = K
    if K <= tk:
        tk = K                       # whole reduction in one block (common)
    else:
        t = (tk // 128) * 128
        chosen = None
        while t >= 128:
            if K % t == 0:
                chosen = t
                break
            t -= 128
        if chosen is not None:
            tk = chosen
        else:
            # Rare: K > tk and no multiple-of-128 tile divides it.  Zero-pad
            # K (zeros contribute 0 to the f32 accumulator).
            tk = (tk // 128) * 128
            kp = _round_up(K, tk)
    grid_k = kp // tk

    if kp != K:
        x2d = jnp.pad(x2d, ((0, 0), (0, kp - K)))
        weight = jnp.pad(weight, ((0, 0), (0, kp - K)))

    b2d = bias.reshape(1, N)

    # ---- VMEM budget (double-buffered inputs/outputs + f32 accumulator).
    x_item = jnp.dtype(x2d.dtype).itemsize
    w_item = jnp.dtype(weight.dtype).itemsize
    o_item = jnp.dtype(out_dtype).itemsize
    footprint = (2 * tm * tk * x_item + 2 * tn * tk * w_item
                 + 2 * tm * tn * o_item + 2 * tn * 4
                 + (tm * tn * 4 if grid_k > 1 else 0))
    # Default tiles stay well under v7x's 64 MiB physical VMEM.
    vmem_limit = min(96 * 1024 * 1024,
                     max(48 * 1024 * 1024, (footprint * 3) // 2))

    cost = pl.CostEstimate(
        flops=2 * m * N * K,
        transcendentals=0,
        bytes_accessed=(m * kp * x_item + N * kp * w_item
                        + N * jnp.dtype(bias.dtype).itemsize
                        + m * N * o_item))

    # Bias is kept as a per-(j) (1, tn) block (tiny DMA, index constant across
    # the inner K axis so Pallas skips redundant copies); a full-row resident
    # block would need an in-kernel dynamic lane slice that is unsafe for
    # ragged N.
    if grid_k > 1:
        grid = (grid_m, grid_n, grid_k)
        in_specs = [
            pl.BlockSpec((tm, tk), lambda i, j, k: (i, k)),   # x tile
            pl.BlockSpec((tn, tk), lambda i, j, k: (j, k)),   # W tile (N, K)
            pl.BlockSpec((1, tn), lambda i, j, k: (0, j)),    # bias tile
        ]
        out_spec = pl.BlockSpec((tm, tn), lambda i, j, k: (i, j))
        scratch = [pltpu.VMEM((tm, tn), jnp.float32)]
        dims = ("parallel", "parallel", "arbitrary")
        kernel = functools.partial(_linear_kernel_multi_k, compute_dtype=cd)
    else:
        grid = (grid_m, grid_n)
        in_specs = [
            pl.BlockSpec((tm, tk), lambda i, j: (i, 0)),
            pl.BlockSpec((tn, tk), lambda i, j: (j, 0)),
            pl.BlockSpec((1, tn), lambda i, j: (0, j)),
        ]
        out_spec = pl.BlockSpec((tm, tn), lambda i, j: (i, j))
        scratch = []
        dims = ("parallel", "parallel")
        kernel = functools.partial(_linear_kernel_single_k, compute_dtype=cd)

    out2d = pl.pallas_call(
        kernel,
        out_shape=jax.ShapeDtypeStruct((m, N), out_dtype),
        grid_spec=pltpu.PrefetchScalarGridSpec(
            num_scalar_prefetch=0,
            grid=grid,
            in_specs=in_specs,
            out_specs=out_spec,
            scratch_shapes=scratch,
        ),
        compiler_params=pltpu.CompilerParams(
            dimension_semantics=dims,
            vmem_limit_bytes=int(vmem_limit)),
        cost_estimate=cost,
    )(x2d, weight, b2d)

    return out2d.reshape(*lead, N)


def init_img_linear_params(key, input_dim, output_dim, dtype=jnp.float32):
    """Deterministic init mimicking nn.Linear's default (kaiming-uniform-ish)."""
    k_w, k_b = jax.random.split(key)
    bound = 1.0 / math.sqrt(input_dim)
    weight = jax.random.uniform(
        k_w, (output_dim, input_dim), dtype=dtype, minval=-bound, maxval=bound)
    bias = jax.random.uniform(
        k_b, (output_dim,), dtype=dtype, minval=-bound, maxval=bound)
    return weight, bias


if __name__ == "__main__":
    key = jax.random.PRNGKey(0)
    k_x, k_p = jax.random.split(key)

    batch, seq, input_dim, output_dim = 2, 8, 32, 16

    # image_features: (batch, seq, input_dim), feature-last layout.
    x = jax.random.normal(k_x, (batch, seq, input_dim), dtype=jnp.float32)
    weight, bias = init_img_linear_params(k_p, input_dim, output_dim)

    # Default path: bf16 MXU inputs, f32 accumulation.
    out = img_linear(x, weight, bias)
    out = jax.block_until_ready(out)
    assert out.shape == (batch, seq, output_dim)

    # Tight check against a bf16-compute / f32-accumulate reference (same math).
    xb = x.astype(jnp.bfloat16).reshape(-1, input_dim)
    wb = weight.astype(jnp.bfloat16)
    ref_bf16 = lax.dot_general(
        xb, wb, dimension_numbers=(((1,), (1,)), ((), ())),
        preferred_element_type=jnp.float32)
    ref_bf16 = ref_bf16.reshape(batch, seq, output_dim) + bias
    assert jnp.allclose(out, ref_bf16, atol=2e-3, rtol=2e-3)

    # Loose check against the exact-f32 nn.Linear semantics.
    ref_f32 = x @ weight.T + bias
    assert jnp.allclose(out, ref_f32, atol=1e-1, rtol=1e-1)

    # Exact-precision path (compute_dtype=None) must match f32 reference tightly.
    out_f32 = jax.block_until_ready(img_linear(x, weight, bias, compute_dtype=None))
    assert jnp.allclose(out_f32, ref_f32, atol=1e-5, rtol=1e-5)

    print("KERNEL_OK")
</pallas_src>

<mosaic_0001>
module attributes {stable_mosaic.version = 11 : i64} {
  func.func @_linear_kernel_single_k(%arg0: i32, %arg1: i32, %arg2: memref<16x32xf32, #tpu.memory_space<vmem>>, %arg3: memref<16x32xf32, #tpu.memory_space<vmem>>, %arg4: memref<1x16xf32, #tpu.memory_space<vmem>>, %arg5: memref<16x16xf32, #tpu.memory_space<vmem>>) attributes {dimension_semantics = [#tpu.dimension_semantics<parallel>, #tpu.dimension_semantics<parallel>], iteration_bounds = array<i64: 1, 1>, scalar_prefetch = 0 : i64, scratch_operands = 0 : i64, tpu.core_type = #tpu.core_type<tc>, window_params = [{transform_indices = @transform_0, window_bounds = array<i64: 16, 32>}, {transform_indices = @transform_1, window_bounds = array<i64: 16, 32>}, {transform_indices = @transform_2, window_bounds = array<i64: 1, 16>}, {transform_indices = @transform_3, window_bounds = array<i64: 16, 16>}]} {
    %c0 = arith.constant 0 : index
    %c0_0 = arith.constant 0 : index
    %0 = vector.load %arg2[%c0, %c0_0] : memref<16x32xf32, #tpu.memory_space<vmem>>, vector<16x32xf32>
    %c0_1 = arith.constant 0 : index
    %c0_2 = arith.constant 0 : index
    %1 = vector.load %arg3[%c0_1, %c0_2] : memref<16x32xf32, #tpu.memory_space<vmem>>, vector<16x32xf32>
    %2 = arith.truncf %0 : vector<16x32xf32> to vector<16x32xbf16>
    %3 = arith.truncf %1 : vector<16x32xf32> to vector<16x32xbf16>
    %cst = arith.constant dense<0.000000e+00> : vector<16x16xf32>
    %4 = tpu.matmul %2, %3, %cst {dimension_numbers = #tpu.dot_dimension_numbers<[1], [1], [0], [0], [0, 0, 1, 0], [], []>} : vector<16x32xbf16>, vector<16x32xbf16>, vector<16x16xf32> -> vector<16x16xf32>
    %c0_3 = arith.constant 0 : index
    %c0_4 = arith.constant 0 : index
    %5 = vector.load %arg4[%c0_3, %c0_4] : memref<1x16xf32, #tpu.memory_space<vmem>>, vector<1x16xf32>
    %6 = vector.broadcast %5 : vector<1x16xf32> to vector<16x16xf32>
    %7 = arith.addf %4, %6 : vector<16x16xf32>
    %c0_5 = arith.constant 0 : index
    %c0_6 = arith.constant 0 : index
    %8 = vector.load %arg5[%c0_5, %c0_6] : memref<16x16xf32, #tpu.memory_space<vmem>>, vector<16x16xf32>
    tpu.vector_store %arg5[%c0_5, %c0_6], %7 {strides = array<i32>} : memref<16x16xf32, #tpu.memory_space<vmem>>, vector<16x16xf32>,
    return
  }
  func.func @transform_0(%arg0: i32, %arg1: i32) -> (i32, i32) {
    %c0_i32 = arith.constant 0 : i32
    %c0_i32_0 = arith.constant 0 : i32
    return %arg0, %c0_i32 : i32, i32
  }
  func.func @transform_1(%arg0: i32, %arg1: i32) -> (i32, i32) {
    %c0_i32 = arith.constant 0 : i32
    %c0_i32_0 = arith.constant 0 : i32
    return %arg1, %c0_i32 : i32, i32
  }
  func.func @transform_2(%arg0: i32, %arg1: i32) -> (i32, i32) {
    %c0_i32 = arith.constant 0 : i32
    %c0_i32_0 = arith.constant 0 : i32
    return %c0_i32, %arg1 : i32, i32
  }
  func.func @transform_3(%arg0: i32, %arg1: i32) -> (i32, i32) {
    %c0_i32 = arith.constant 0 : i32
    return %arg0, %arg1 : i32, i32
  }
}

</mosaic_0001>

<bundles_post_ra>
// kernel: tpu_custom_call.1
= control target key start
LH: loop header
LB: loop body
LE: loop exit
PB: predicated region body
PF: predicated region fallthrough
CT: control target
= control target key end

     0   :  { %8 = vsyncpa [#allocation3], 0  ;;  %s290_s0 = inlined_call_operand.hbm [shape: f32[16,32], index: 0, kind: input, shape index: {}]   ;;  %s291_s1 = inlined_call_operand.hbm [shape: f32[16,32], index: 1, kind: input, shape index: {}]   ;;  %s292_s2 = inlined_call_operand.vmem [shape: f32[1,16], index: 2, kind: input, shape index: {}]   ;;  %s293_s3 = inlined_call_operand.hbm [shape: f32[16,16], index: 3, kind: output, shape index: {}]  }
   0x1   :  { %9 = vsyncpa [#allocation6], 0 }
   0x2   :  { %10 = vsyncpa [#allocation4], 0  ;;  %s215_s12 = smov [#allocation2]   ;;  %s143_s16 = scalar_lea.hbm %s290_s0, 256 }
   0x3   :  { %s16_s13 = sshll.u32 %s215_s12, 4  ;;  %p144_p0 = scmp.ne.s32.totalorder %s290_s0, %s143_s16  ;;  %s17_s13 = int_to_ptr.vmem [resolvable:$true] %s16_s13 }
   0x4   :  { %p147_p1 = scmp.lt.u32.totalorder %s143_s16, %s290_s0 }
   0x6   :  { %p149_p2 = pnand %p147_p1, %p144_p0 }
   0x8   :  { %152 = shalt.err (!%p149_p2)
}
   0x9   :  { %s153_s21 = scalar_lea.vmem %s17_s13, 256  ;;  %p158_p4 = scmp.lt.s32.totalorder %s17_s13, %s17_s13 }
   0xa   :  { %p154_p3 = scmp.ne.s32.totalorder %s17_s13, %s153_s21  ;;  %p159_p5 = scmp.lt.s32.totalorder %s153_s21, %s153_s21 }
   0xc   :  { %p160_p6 = por %p159_p5, %p158_p4 }
   0xe   :  { %p161_p7 = pnand %p160_p6, %p154_p3 }
  0x10   :  { %164 = shalt.err (!%p161_p7)
}
  0x11   :  { %s216_s22 = smov 128   ;;  %s217_s23 = smov 8  }
  0x12   :  { %22 = dma.hbm_to_vmem [thread:$0]  %s290_s0, 256, %s17_s13, [#allocation3], %s216_s22, %s216_s22, %s217_s23  }
  0x13   :  { %s218_s26 = smov [#allocation5]   ;;  %s165_s30 = scalar_lea.hbm %s291_s1, 256 }
  0x14   :  { %s28_s27 = sshll.u32 %s218_s26, 4  ;;  %p166_p8 = scmp.ne.s32.totalorder %s291_s1, %s165_s30  ;;  %s29_s27 = int_to_ptr.vmem [resolvable:$true] %s28_s27 }
  0x15   :  { %p169_p9 = scmp.lt.u32.totalorder %s165_s30, %s291_s1 }
  0x17   :  { %p171_p10 = pnand %p169_p9, %p166_p8 }
  0x19   :  { %174 = shalt.err (!%p171_p10)
}
  0x1a   :  { %s175_s8 = scalar_lea.vmem %s29_s27, 256  ;;  %p180_p12 = scmp.lt.s32.totalorder %s29_s27, %s29_s27 }
  0x1b   :  { %p176_p11 = scmp.ne.s32.totalorder %s29_s27, %s175_s8  ;;  %p181_p13 = scmp.lt.s32.totalorder %s175_s8, %s175_s8 }
  0x1d   :  { %p182_p0 = por %p181_p13, %p180_p12 }
  0x1f   :  { %p183_p1 = pnand %p182_p0, %p176_p11 }
  0x21   :  { %186 = shalt.err (!%p183_p1)
}
  0x22   :  { %34 = dma.hbm_to_vmem [thread:$0]  %s291_s1, 256, %s29_s27, [#allocation6], %s216_s22, %s216_s22, %s217_s23  }
  0x23   :  { %209 = dma.done.wait [#allocation3], 256  }
  0x24   :  { %210 = vsyncadd [#allocation3], 4294967040 }
  0x25   :  { %211 = dma.done.wait [#allocation6], 256  }
  0x26   :  { %212 = vsyncadd [#allocation6], 4294967040  ;;  %v219_v0 = vmov 0.0   ;;  %vm220_vm0 = vmmov 0   ;;  %v46_v1 = vld [vmem:[#allocation5] sm:$0xff]  ;;  %v47_v2 = vld [vmem:[#allocation5 + $0x8] sm:$0xff] }
  0x27   :  { %130 = vmatprep.subr.bf16.mxu0 %v219_v0  ;;  %132 = vmatprep.mubr.msk.bf16.mxu0 %vm220_vm0, %v219_v0  ;;  %vm57_vm1 = vcmask 261120   ;;  %v49_v3 = vpack.c.bf16 %v47_v2, %v46_v1  ;;  %v44_v5 = vld [vmem:[#allocation2] sm:$0xff]  ;;  %v45_v6 = vld [vmem:[#allocation2 + $0x8] sm:$0xff]  ;;  %vm105_vm2 = vcmask 130048   ;;  %s221_s11 = smov [#allocation7]  }
  0x28   :  { %v48_v7 = vpack.c.bf16 %v45_v6, %v44_v5  ;;  %v126_v8 = vld [vmem:[%s292_s2] ss:$0 sm:$0xff]  ;;  %s113_s12 = sshll.u32 %s221_s11, 4  ;;  %s114_s12 = int_to_ptr.vmem [resolvable:$true] %s113_s12 }
  0x29   :  { %v62_v4 = vsel %vm57_vm1, %v49_v3, 0  ;;  %s187_s13 = scalar_lea.vmem %s114_s12, 256  ;;  %p192_p3 = scmp.lt.s32.totalorder %s114_s12, %s114_s12 }
  0x2a   :  { %131 = vmatpush3.bf16.xpose.msra.mxu0 %v62_v4  ;;  %p188_p2 = scmp.ne.s32.totalorder %s114_s12, %s187_s13  ;;  %p193_p4 = scmp.lt.s32.totalorder %s187_s13, %s187_s13 }
  0x2c   :  { %p194_p5 = por %p193_p4, %p192_p3 }
  0x2e   :  { %p195_p6 = pnand %p194_p5, %p188_p2 }
  0x31   :  { %133 = vmatmul.mubr.msk.bf16.vlgmr.msra.gmra.mrb[0].mxu0 %vm57_vm1, %v48_v7 }
 0x104   :  { %v98_v9 = vpop.f32.mrb[0].mxu0 }
 0x105   :  { %v99_v10 = vadd.f32 %v126_v8, %v98_v9  ;;  %v134_v11 = vpop.f32.mrb[1].mxu0 }
 0x106   :  { %v101_v12 = vpop.f32.mrb[2].mxu0 }
 0x107   :  { %v102_v13 = vadd.f32 %v126_v8, %v101_v12  ;;  %v135_v14 = vpop.f32.mrb[3].mxu0  ;;  %106 = vst.msk [vmem:[#allocation7] sm:$0xff] %vm105_vm2, %v99_v10 }
 0x109   :  { %107 = vst.msk [vmem:[#allocation7 + $0x8] sm:$0xff] %vm105_vm2, %v102_v13 }
 0x10a   :  { %198 = shalt.err (!%p195_p6)
}
 0x10b   :  { %s199_s15 = scalar_lea.hbm %s293_s3, 256 }
 0x10c   :  { %p200_p7 = scmp.ne.s32.totalorder %s293_s3, %s199_s15  ;;  %p203_p8 = scmp.lt.u32.totalorder %s199_s15, %s293_s3 }
 0x10e   :  { %p205_p9 = pnand %p203_p8, %p200_p7 }
 0x110   :  { %208 = shalt.err (!%p205_p9)
}
 0x111   :  { %119 = dma.vmem_to_hbm [thread:$0]  %s114_s12, 256, %s293_s3, [#allocation4], %s216_s22, %s216_s22, %s217_s23  }
 0x112   :  { %213 = dma.done.wait [#allocation4], 256  }
 0x113   :  { %214 = vsyncadd [#allocation4], 4294967040 }
 0x114   :  { %123 = vsyncpa [#allocation3], 1 }
 0x115   :  { %124 = vsyncpa [#allocation6], 1 }
 0x116   :  { %125 = vsyncpa [#allocation4], 1 }

</bundles_post_ra>
